<compile_context>
chip_gen: v7x
topology: tpu7x:2x2x1
jax: 0.10.0
libtpu: 0.0.40
codegen_flags: <defaults>
</compile_context>

<pallas_src>
import functools

import jax
import jax.numpy as jnp
from jax.experimental import pallas as pl
from jax.experimental.pallas import tpu as pltpu


def _round_up(x, n):
    return (x + n - 1) // n * n


def _vmem_estimate(tile_m, dim, ffn, dout_p, x_bytes, w_bytes):
    """Rough per-stage VMEM working set in bytes."""
    return (2 * tile_m * (dim + dout_p) * x_bytes                 # x/out tiles (2-buf)
            + 2 * (dim * ffn + ffn * dout_p + 4 * ffn) * w_bytes  # W1, W2, biases, LN
            + 2 * tile_m * ffn * 4)                               # f32 hidden + slack


def _pick_tile_m(m, dim, ffn, dout_p, x_bytes, w_bytes, budget=24 * 2**20):
    """Largest row tile (multiple of 8, <=512) fitting a conservative VMEM
    budget that is safe across v5e / v6e / v7x (64 MiB physical VMEM)."""
    m_cap = _round_up(max(m, 1), 8)
    tile = 8
    for cand in (512, 256, 128, 64, 32, 16, 8):
        if cand > m_cap:
            continue
        if _vmem_estimate(cand, dim, ffn, dout_p, x_bytes, w_bytes) <= budget:
            tile = cand
            break
    # Keep >= 2 grid steps when possible so both v7x TensorCores get work and
    # the input/output pipeline actually overlaps.
    while tile > 8 and pl.cdiv(m, tile) < 2:
        tile //= 2
    return tile


def mlp_kernel(x_ref, w1_ref, b1_ref, w2_ref, b2_ref, g_ref, bt_ref, o_ref,
               *, is_post_act_ln, eps):
    # x_ref: (TM, dim); w1_ref: (dim, ffn); w2_ref: (ffn, dout_p).
    x = x_ref[...]

    # linear1 + relu: operands keep the input dtype (bf16 stays on the fast
    # MXU path); accumulation is f32.
    h = jnp.dot(x, w1_ref[...], preferred_element_type=jnp.float32)
    h = h + b1_ref[...].astype(jnp.float32)
    h = jnp.maximum(h, 0.0)

    # Optional post-activation LayerNorm (unbiased=False variance, eps inside
    # rsqrt), kept in f32 on the VPU/EUP.
    if is_post_act_ln:
        mean = jnp.mean(h, axis=-1, keepdims=True)
        var = jnp.mean(jnp.square(h - mean), axis=-1, keepdims=True)
        inv_std = jax.lax.rsqrt(var + eps)
        h = (g_ref[...].astype(jnp.float32) * (h - mean) * inv_std
             + bt_ref[...].astype(jnp.float32))

    # dropout: identity at inference (model.eval()).

    # linear2: cast hidden back to the weight dtype (bf16 weights -> bf16 MXU
    # operands), f32 accumulation.
    y = jnp.dot(h.astype(w2_ref.dtype), w2_ref[...],
                preferred_element_type=jnp.float32)
    y = y + b2_ref[...].astype(jnp.float32)
    o_ref[...] = y.astype(o_ref.dtype)


def mlp_pallas(x, w1, b1, w2, b2, gamma, beta, *,
               is_post_act_ln=False, eps=1e-5, tile_m=None):
    orig_shape = x.shape
    dim = orig_shape[-1]
    ffn = w1.shape[1]
    dout = w2.shape[1]

    # Lane-dense output: pad the output feature dim to a multiple of 128 on
    # the (small) weight side so stores are full-lane vst, not masked vst.msk.
    # For production shapes (dout % 128 == 0) this is a no-op.
    dout_p = _round_up(dout, 128)
    if dout_p != dout:
        w2 = jnp.pad(w2, ((0, 0), (0, dout_p - dout)))
        b2 = jnp.pad(b2, (0, dout_p - dout))

    x2 = x.reshape(-1, dim)
    m = x2.shape[0]

    x_bytes = x2.dtype.itemsize
    w_bytes = w1.dtype.itemsize
    if tile_m is None:
        tile_m = _pick_tile_m(m, dim, ffn, dout_p, x_bytes, w_bytes)
    num_tiles = pl.cdiv(m, tile_m)

    est = _vmem_estimate(tile_m, dim, ffn, dout_p, x_bytes, w_bytes)
    vmem_limit = int(min(56 * 2**20, max(32 * 2**20, 2 * est)))

    kernel = functools.partial(mlp_kernel,
                               is_post_act_ln=is_post_act_ln, eps=float(eps))

    flops = 2 * m * dim * ffn + 2 * m * ffn * dout_p
    bytes_accessed = (x2.size * x_bytes + m * dout_p * x_bytes
                      + (w1.size + w2.size) * w_bytes
                      + (b1.size + b2.size + gamma.size + beta.size) * w_bytes)
    cost = pl.CostEstimate(flops=int(flops),
                           transcendentals=int(m) if is_post_act_ln else 0,
                           bytes_accessed=int(bytes_accessed))

    args = (x2, w1, b1.reshape(1, -1), w2, b2.reshape(1, -1),
            gamma.reshape(1, -1), beta.reshape(1, -1))

    def run(single_buffer_resident):
        def const2d(shape):
            # Grid-invariant block (weights / biases / LN params): constant
            # index map; single-buffer it when the JAX build allows, since
            # default double-buffering doubles its VMEM cost for no benefit.
            if single_buffer_resident:
                return pl.BlockSpec(shape, lambda i: (0, 0),
                                    pipeline_mode=pl.Buffered(1))
            return pl.BlockSpec(shape, lambda i: (0, 0))

        grid_spec = pltpu.PrefetchScalarGridSpec(
            num_scalar_prefetch=0,
            grid=(num_tiles,),
            in_specs=[
                pl.BlockSpec((tile_m, dim), lambda i: (i, 0)),  # x row tile
                const2d((dim, ffn)),                            # W1 (resident)
                const2d((1, ffn)),                              # b1
                const2d((ffn, dout_p)),                         # W2 (resident)
                const2d((1, dout_p)),                           # b2
                const2d((1, ffn)),                              # LN gamma
                const2d((1, ffn)),                              # LN beta
            ],
            out_specs=pl.BlockSpec((tile_m, dout_p), lambda i: (i, 0)),
        )
        return pl.pallas_call(
            kernel,
            out_shape=jax.ShapeDtypeStruct((m, dout_p), x.dtype),
            grid_spec=grid_spec,
            compiler_params=pltpu.CompilerParams(
                dimension_semantics=("parallel",),
                vmem_limit_bytes=vmem_limit),
            cost_estimate=cost,
        )(*args)

    try:
        out = run(True)
    except Exception:
        # pipeline_mode=pl.Buffered(1) not supported by this JAX build; fall
        # back to default double-buffered resident weights.
        out = run(False)

    if dout_p != dout:
        out = out[:, :dout]
    return out.reshape(*orig_shape[:-1], dout)


def mlp_reference(x, w1, b1, w2, b2, gamma, beta, *, is_post_act_ln=False,
                  eps=1e-5):
    h = jnp.maximum(x @ w1 + b1, 0.0)
    if is_post_act_ln:
        mean = jnp.mean(h, axis=-1, keepdims=True)
        var = jnp.mean((h - mean) ** 2, axis=-1, keepdims=True)
        h = gamma * (h - mean) / jnp.sqrt(var + eps) + beta
    return h @ w2 + b2


if __name__ == "__main__":
    # Small shapes: batch=2, seq=8, dim=32, ffn_dim=64, d_model_out=32.
    B, S, DIM, FFN, DOUT = 2, 8, 32, 64, 32

    key = jax.random.PRNGKey(0)
    kx, k1, k2, k3, k4 = jax.random.split(key, 5)

    x = jax.random.normal(kx, (B, S, DIM), dtype=jnp.float32)
    w1 = jax.random.normal(k1, (DIM, FFN), dtype=jnp.float32) * 0.1
    b1 = jax.random.normal(k2, (FFN,), dtype=jnp.float32) * 0.1
    w2 = jax.random.normal(k3, (FFN, DOUT), dtype=jnp.float32) * 0.1
    b2 = jax.random.normal(k4, (DOUT,), dtype=jnp.float32) * 0.1
    gamma = jnp.ones((FFN,), dtype=jnp.float32)   # LayerNorm a_2
    beta = jnp.zeros((FFN,), dtype=jnp.float32)   # LayerNorm b_2

    ok = True

    # f32 path, with and without post-activation LayerNorm.
    for post_ln in (False, True):
        y = jax.block_until_ready(
            mlp_pallas(x, w1, b1, w2, b2, gamma, beta, is_post_act_ln=post_ln))
        y_ref = mlp_reference(x, w1, b1, w2, b2, gamma, beta,
                              is_post_act_ln=post_ln)
        ok &= bool(jnp.allclose(y, y_ref, atol=1e-5, rtol=1e-5))

    # Ragged row count (M = 15, not a multiple of the tile): no wrapper pad,
    # the last block is masked on writeback by Pallas.
    xr = jax.random.normal(kx, (3, 5, DIM), dtype=jnp.float32)
    y = jax.block_until_ready(
        mlp_pallas(xr, w1, b1, w2, b2, gamma, beta, is_post_act_ln=True))
    y_ref = mlp_reference(xr, w1, b1, w2, b2, gamma, beta, is_post_act_ln=True)
    ok &= bool(jnp.allclose(y, y_ref, atol=1e-5, rtol=1e-5))

    # bf16 fast path: bf16 MXU operands, f32 accumulation (looser tolerance).
    bf = lambda a: a.astype(jnp.bfloat16)
    f32 = lambda a: a.astype(jnp.float32)
    yb = jax.block_until_ready(
        mlp_pallas(bf(x), bf(w1), bf(b1), bf(w2), bf(b2), bf(gamma), bf(beta),
                   is_post_act_ln=True))
    yb_ref = mlp_reference(f32(bf(x)), f32(bf(w1)), f32(bf(b1)), f32(bf(w2)),
                           f32(bf(b2)), f32(bf(gamma)), f32(bf(beta)),
                           is_post_act_ln=True)
    ok &= bool(jnp.allclose(f32(yb), yb_ref, atol=5e-2, rtol=5e-2))

    if ok:
        print("KERNEL_OK")
    else:
        print("MISMATCH")
</pallas_src>

<mosaic_0001>
module attributes {stable_mosaic.version = 11 : i64} {
  func.func @mlp_kernel(%arg0: i32, %arg1: memref<8x32xf32, #tpu.memory_space<vmem>>, %arg2: memref<32x64xf32, #tpu.memory_space<vmem>>, %arg3: memref<1x64xf32, #tpu.memory_space<vmem>>, %arg4: memref<64x128xf32, #tpu.memory_space<vmem>>, %arg5: memref<1x128xf32, #tpu.memory_space<vmem>>, %arg6: memref<1x64xf32, #tpu.memory_space<vmem>>, %arg7: memref<1x64xf32, #tpu.memory_space<vmem>>, %arg8: memref<8x128xf32, #tpu.memory_space<vmem>>) attributes {dimension_semantics = [#tpu.dimension_semantics<parallel>], iteration_bounds = array<i64: 2>, scalar_prefetch = 0 : i64, scratch_operands = 0 : i64, tpu.core_type = #tpu.core_type<tc>, window_params = [{transform_indices = @transform_0, window_bounds = array<i64: 8, 32>}, {pipeline_mode = #tpu.pipeline_mode<synchronous>, transform_indices = @transform_1, window_bounds = array<i64: 32, 64>}, {pipeline_mode = #tpu.pipeline_mode<synchronous>, transform_indices = @transform_2, window_bounds = array<i64: 1, 64>}, {pipeline_mode = #tpu.pipeline_mode<synchronous>, transform_indices = @transform_3, window_bounds = array<i64: 64, 128>}, {pipeline_mode = #tpu.pipeline_mode<synchronous>, transform_indices = @transform_4, window_bounds = array<i64: 1, 128>}, {pipeline_mode = #tpu.pipeline_mode<synchronous>, transform_indices = @transform_5, window_bounds = array<i64: 1, 64>}, {pipeline_mode = #tpu.pipeline_mode<synchronous>, transform_indices = @transform_6, window_bounds = array<i64: 1, 64>}, {transform_indices = @transform_7, window_bounds = array<i64: 8, 128>}]} {
    %c0 = arith.constant 0 : index
    %c0_0 = arith.constant 0 : index
    %0 = vector.load %arg1[%c0, %c0_0] : memref<8x32xf32, #tpu.memory_space<vmem>>, vector<8x32xf32>
    %c0_1 = arith.constant 0 : index
    %c0_2 = arith.constant 0 : index
    %1 = vector.load %arg2[%c0_1, %c0_2] : memref<32x64xf32, #tpu.memory_space<vmem>>, vector<32x64xf32>
    %cst = arith.constant dense<0.000000e+00> : vector<8x64xf32>
    %2 = tpu.matmul %0, %1, %cst {dimension_numbers = #tpu.dot_dimension_numbers<[1], [0], [0], [1], [0, 0, 1, 1], [], []>} : vector<8x32xf32>, vector<32x64xf32>, vector<8x64xf32> -> vector<8x64xf32>
    %c0_3 = arith.constant 0 : index
    %c0_4 = arith.constant 0 : index
    %3 = vector.load %arg3[%c0_3, %c0_4] : memref<1x64xf32, #tpu.memory_space<vmem>>, vector<1x64xf32>
    %4 = vector.broadcast %3 : vector<1x64xf32> to vector<8x64xf32>
    %5 = arith.addf %2, %4 : vector<8x64xf32>
    %cst_5 = arith.constant 0.000000e+00 : f32
    %6 = vector.broadcast %cst_5 : f32 to vector<8x64xf32>
    %7 = arith.maximumf %5, %6 : vector<8x64xf32>
    %c0_6 = arith.constant 0 : index
    %c0_7 = arith.constant 0 : index
    %8 = vector.load %arg4[%c0_6, %c0_7] : memref<64x128xf32, #tpu.memory_space<vmem>>, vector<64x128xf32>
    %cst_8 = arith.constant dense<0.000000e+00> : vector<8x128xf32>
    %9 = tpu.matmul %7, %8, %cst_8 {dimension_numbers = #tpu.dot_dimension_numbers<[1], [0], [0], [1], [0, 0, 1, 1], [], []>} : vector<8x64xf32>, vector<64x128xf32>, vector<8x128xf32> -> vector<8x128xf32>
    %c0_9 = arith.constant 0 : index
    %c0_10 = arith.constant 0 : index
    %10 = vector.load %arg5[%c0_9, %c0_10] : memref<1x128xf32, #tpu.memory_space<vmem>>, vector<1x128xf32>
    %11 = vector.broadcast %10 : vector<1x128xf32> to vector<8x128xf32>
    %12 = arith.addf %9, %11 : vector<8x128xf32>
    %c0_11 = arith.constant 0 : index
    %c0_12 = arith.constant 0 : index
    %13 = vector.load %arg8[%c0_11, %c0_12] : memref<8x128xf32, #tpu.memory_space<vmem>>, vector<8x128xf32>
    tpu.vector_store %arg8[%c0_11, %c0_12], %12 {strides = array<i32>} : memref<8x128xf32, #tpu.memory_space<vmem>>, vector<8x128xf32>,
    return
  }
  func.func @transform_0(%arg0: i32) -> (i32, i32) {
    %c0_i32 = arith.constant 0 : i32
    %c0_i32_0 = arith.constant 0 : i32
    return %arg0, %c0_i32 : i32, i32
  }
  func.func @transform_1(%arg0: i32) -> (i32, i32) {
    %c0_i32 = arith.constant 0 : i32
    %c0_i32_0 = arith.constant 0 : i32
    %c0_i32_1 = arith.constant 0 : i32
    return %c0_i32, %c0_i32_0 : i32, i32
  }
  func.func @transform_2(%arg0: i32) -> (i32, i32) {
    %c0_i32 = arith.constant 0 : i32
    %c0_i32_0 = arith.constant 0 : i32
    %c0_i32_1 = arith.constant 0 : i32
    return %c0_i32, %c0_i32_0 : i32, i32
  }
  func.func @transform_3(%arg0: i32) -> (i32, i32) {
    %c0_i32 = arith.constant 0 : i32
    %c0_i32_0 = arith.constant 0 : i32
    %c0_i32_1 = arith.constant 0 : i32
    return %c0_i32, %c0_i32_0 : i32, i32
  }
  func.func @transform_4(%arg0: i32) -> (i32, i32) {
    %c0_i32 = arith.constant 0 : i32
    %c0_i32_0 = arith.constant 0 : i32
    %c0_i32_1 = arith.constant 0 : i32
    return %c0_i32, %c0_i32_0 : i32, i32
  }
  func.func @transform_5(%arg0: i32) -> (i32, i32) {
    %c0_i32 = arith.constant 0 : i32
    %c0_i32_0 = arith.constant 0 : i32
    %c0_i32_1 = arith.constant 0 : i32
    return %c0_i32, %c0_i32_0 : i32, i32
  }
  func.func @transform_6(%arg0: i32) -> (i32, i32) {
    %c0_i32 = arith.constant 0 : i32
    %c0_i32_0 = arith.constant 0 : i32
    %c0_i32_1 = arith.constant 0 : i32
    return %c0_i32, %c0_i32_0 : i32, i32
  }
  func.func @transform_7(%arg0: i32) -> (i32, i32) {
    %c0_i32 = arith.constant 0 : i32
    %c0_i32_0 = arith.constant 0 : i32
    return %arg0, %c0_i32 : i32, i32
  }
}

module attributes {stable_mosaic.version = 11 : i64} {
  func.func @mlp_kernel(%arg0: i32, %arg1: memref<8x32xf32, #tpu.memory_space<vmem>>, %arg2: memref<32x64xf32, #tpu.memory_space<vmem>>, %arg3: memref<1x64xf32, #tpu.memory_space<vmem>>, %arg4: memref<64x128xf32, #tpu.memory_space<vmem>>, %arg5: memref<1x128xf32, #tpu.memory_space<vmem>>, %arg6: memref<1x64xf32, #tpu.memory_space<vmem>>, %arg7: memref<1x64xf32, #tpu.memory_space<vmem>>, %arg8: memref<8x128xf32, #tpu.memory_space<vmem>>) attributes {dimension_semantics = [#tpu.dimension_semantics<parallel>], iteration_bounds = array<i64: 2>, scalar_prefetch = 0 : i64, scratch_operands = 0 : i64, tpu.core_type = #tpu.core_type<tc>, window_params = [{transform_indices = @transform_0, window_bounds = array<i64: 8, 32>}, {pipeline_mode = #tpu.pipeline_mode<synchronous>, transform_indices = @transform_1, window_bounds = array<i64: 32, 64>}, {pipeline_mode = #tpu.pipeline_mode<synchronous>, transform_indices = @transform_2, window_bounds = array<i64: 1, 64>}, {pipeline_mode = #tpu.pipeline_mode<synchronous>, transform_indices = @transform_3, window_bounds = array<i64: 64, 128>}, {pipeline_mode = #tpu.pipeline_mode<synchronous>, transform_indices = @transform_4, window_bounds = array<i64: 1, 128>}, {pipeline_mode = #tpu.pipeline_mode<synchronous>, transform_indices = @transform_5, window_bounds = array<i64: 1, 64>}, {pipeline_mode = #tpu.pipeline_mode<synchronous>, transform_indices = @transform_6, window_bounds = array<i64: 1, 64>}, {transform_indices = @transform_7, window_bounds = array<i64: 8, 128>}]} {
    %c0 = arith.constant 0 : index
    %c0_0 = arith.constant 0 : index
    %0 = vector.load %arg1[%c0, %c0_0] : memref<8x32xf32, #tpu.memory_space<vmem>>, vector<8x32xf32>
    %c0_1 = arith.constant 0 : index
    %c0_2 = arith.constant 0 : index
    %1 = vector.load %arg2[%c0_1, %c0_2] : memref<32x64xf32, #tpu.memory_space<vmem>>, vector<32x64xf32>
    %cst = arith.constant dense<0.000000e+00> : vector<8x64xf32>
    %2 = tpu.matmul %0, %1, %cst {dimension_numbers = #tpu.dot_dimension_numbers<[1], [0], [0], [1], [0, 0, 1, 1], [], []>} : vector<8x32xf32>, vector<32x64xf32>, vector<8x64xf32> -> vector<8x64xf32>
    %c0_3 = arith.constant 0 : index
    %c0_4 = arith.constant 0 : index
    %3 = vector.load %arg3[%c0_3, %c0_4] : memref<1x64xf32, #tpu.memory_space<vmem>>, vector<1x64xf32>
    %4 = vector.broadcast %3 : vector<1x64xf32> to vector<8x64xf32>
    %5 = arith.addf %2, %4 : vector<8x64xf32>
    %cst_5 = arith.constant 0.000000e+00 : f32
    %6 = vector.broadcast %cst_5 : f32 to vector<8x64xf32>
    %7 = arith.maximumf %5, %6 : vector<8x64xf32>
    %c0_6 = arith.constant 0 : index
    %c0_7 = arith.constant 0 : index
    %8 = vector.load %arg4[%c0_6, %c0_7] : memref<64x128xf32, #tpu.memory_space<vmem>>, vector<64x128xf32>
    %cst_8 = arith.constant dense<0.000000e+00> : vector<8x128xf32>
    %9 = tpu.matmul %7, %8, %cst_8 {dimension_numbers = #tpu.dot_dimension_numbers<[1], [0], [0], [1], [0, 0, 1, 1], [], []>} : vector<8x64xf32>, vector<64x128xf32>, vector<8x128xf32> -> vector<8x128xf32>
    %c0_9 = arith.constant 0 : index
    %c0_10 = arith.constant 0 : index
    %10 = vector.load %arg5[%c0_9, %c0_10] : memref<1x128xf32, #tpu.memory_space<vmem>>, vector<1x128xf32>
    %11 = vector.broadcast %10 : vector<1x128xf32> to vector<8x128xf32>
    %12 = arith.addf %9, %11 : vector<8x128xf32>
    %c0_11 = arith.constant 0 : index
    %c0_12 = arith.constant 0 : index
    %13 = vector.load %arg8[%c0_11, %c0_12] : memref<8x128xf32, #tpu.memory_space<vmem>>, vector<8x128xf32>
    tpu.vector_store %arg8[%c0_11, %c0_12], %12 {strides = array<i32>} : memref<8x128xf32, #tpu.memory_space<vmem>>, vector<8x128xf32>,
    return
  }
  func.func @transform_0(%arg0: i32) -> (i32, i32) {
    %c0_i32 = arith.constant 0 : i32
    %c0_i32_0 = arith.constant 0 : i32
    return %arg0, %c0_i32 : i32, i32
  }
  func.func @transform_1(%arg0: i32) -> (i32, i32) {
    %c0_i32 = arith.constant 0 : i32
    %c0_i32_0 = arith.constant 0 : i32
    %c0_i32_1 = arith.constant 0 : i32
    return %c0_i32, %c0_i32_0 : i32, i32
  }
  func.func @transform_2(%arg0: i32) -> (i32, i32) {
    %c0_i32 = arith.constant 0 : i32
    %c0_i32_0 = arith.constant 0 : i32
    %c0_i32_1 = arith.constant 0 : i32
    return %c0_i32, %c0_i32_0 : i32, i32
  }
  func.func @transform_3(%arg0: i32) -> (i32, i32) {
    %c0_i32 = arith.constant 0 : i32
    %c0_i32_0 = arith.constant 0 : i32
    %c0_i32_1 = arith.constant 0 : i32
    return %c0_i32, %c0_i32_0 : i32, i32
  }
  func.func @transform_4(%arg0: i32) -> (i32, i32) {
    %c0_i32 = arith.constant 0 : i32
    %c0_i32_0 = arith.constant 0 : i32
    %c0_i32_1 = arith.constant 0 : i32
    return %c0_i32, %c0_i32_0 : i32, i32
  }
  func.func @transform_5(%arg0: i32) -> (i32, i32) {
    %c0_i32 = arith.constant 0 : i32
    %c0_i32_0 = arith.constant 0 : i32
    %c0_i32_1 = arith.constant 0 : i32
    return %c0_i32, %c0_i32_0 : i32, i32
  }
  func.func @transform_6(%arg0: i32) -> (i32, i32) {
    %c0_i32 = arith.constant 0 : i32
    %c0_i32_0 = arith.constant 0 : i32
    %c0_i32_1 = arith.constant 0 : i32
    return %c0_i32, %c0_i32_0 : i32, i32
  }
  func.func @transform_7(%arg0: i32) -> (i32, i32) {
    %c0_i32 = arith.constant 0 : i32
    %c0_i32_0 = arith.constant 0 : i32
    return %arg0, %c0_i32 : i32, i32
  }
}

</mosaic_0001>

<bundles_post_ra>
// kernel: tpu_custom_call.1
= control target key start
LH: loop header
LB: loop body
LE: loop exit
PB: predicated region body
PF: predicated region fallthrough
CT: control target
= control target key end

     0   :  { %12 = vsyncpa [#allocation3], 0  ;;  %s1206_s0 = inlined_call_operand.hbm [shape: f32[16,32], index: 0, kind: input, shape index: {}]   ;;  %s1207_s1 = inlined_call_operand.hbm [shape: f32[32,64], index: 1, kind: input, shape index: {}]   ;;  %s1208_s2 = inlined_call_operand.vmem [shape: f32[1,64], index: 2, kind: input, shape index: {}]   ;;  %s1209_s3 = inlined_call_operand.hbm [shape: f32[64,128], index: 3, kind: input, shape index: {}]   ;;  %s1210_s4 = inlined_call_operand.vmem [shape: f32[1,128], index: 4, kind: input, shape index: {}]   ;;  %s1211_s5 = inlined_call_operand.vmem [shape: f32[1,64], index: 5, kind: input, shape index: {}]   ;;  %s1212_s6 = inlined_call_operand.vmem [shape: f32[1,64], index: 6, kind: input, shape index: {}]   ;;  %s1213_s7 = inlined_call_operand.hbm [shape: f32[16,128], index: 7, kind: output, shape index: {}]  }
   0x1   :  { %14 = vsyncpa [#allocation3 + $0x1], 0 }
   0x2   :  { %15 = vsyncpa [#allocation6], 0 }
   0x3   :  { %16 = vsyncpa [#allocation4], 0 }
   0x4   :  { %18 = vsyncpa [#allocation4 + $0x1], 0  ;;  %s964_s24 = smov 0   ;;  %s966_s25 = smov 0  }
   0x5   :  { %s968_s26 = smov 0   ;;  %s970_s27 = smov 0  }
   0x6 LB: > { %s985_s5 = sadd.s32 4294967295, %s913_s27   ;;  %s603_s6 = sadd.s32 4294967294, %s913_s27   ;;  %s913_s27 = sphi %s970_s27, %s1233_s27   ;;  %s909_s26 = sphi %s968_s26, %s1232_s26   ;;  %s905_s25 = sphi %s966_s25, %s1231_s25   ;;  %s901_s24 = sphi %s964_s24, %s1230_s24  }
   0x7   : > { %p44_p0 = scmp.ne.s32.totalorder %s905_s25, %s901_s24  ;;  %p1214_p1 = scmp.eq.s32.totalorder %s985_s5, 0 }
   0x8   : > { %p200_p3 = scmp.eq.s32.totalorder %s603_s6, 1  ;;  %p604_p5 = scmp.ge.s32.totalorder %s913_s27, 1 }
   0x9   : > { %p994_p4 = por %p1214_p1, %p44_p0  ;;  %p207_p7 = scmp.lt.s32.totalorder %s913_s27, 3 }
   0xa   : > { %p999_p6 = por %p200_p3, %p44_p0  ;;  %s915_s8 = smov [#allocation5]  }
   0xb   : > { %s1217_s28 = scalar_select %p994_p4, 1, 0 }
   0xc   : > { %s1218_s29 = scalar_select %p999_p6, 1, 0 }
   0xd   : > { %p1004_p8 = pnand %p604_p5, %p207_p7  ;;  %s219_s9 = sshll.u32 %s915_s8, 4  ;;  %s1008_s9 = int_to_ptr.vmem [resolvable:$true] %s219_s9 }
   0xe   : > { %s916_s11 = smov [#allocation7]   ;;  %s757_s15 = scalar_lea.hbm %s1207_s1, 512 }
   0xf   : > { %p697_p9 = pneg %p1004_p8  ;;  %s235_s12 = sshll.u32 %s916_s11, 4  ;;  %s1019_s12 = int_to_ptr.vmem [resolvable:$true] %s235_s12 }
  0x10   : > { %p758_p12 = scmp.ne.s32.totalorder %s1207_s1, %s757_s15  ;;  %p764_p5 = scmp.lt.u32.totalorder %s757_s15, %s1207_s1 }
  0x11   : > { %p1015_p11 = pnand %p697_p9, %p1214_p1 }
  0x13   : > { %p759_p13 = pneg %p1015_p11 }
  0x15   : > { %p760_p0 = pnand %p759_p13, %p758_p12 }
  0x17   : > { %p761_p3 = pneg %p760_p0 }
  0x19   : > { %p766_p7 = pnand %p764_p5, %p761_p3 }
  0x1b   : > { %769 = shalt.err (!%p766_p7)
}
  0x1c   : > { %s770_s20 = scalar_lea.vmem %s1008_s9, 512  ;;  %p778_p2 = scmp.lt.s32.totalorder %s1008_s9, %s1008_s9 }
  0x1d   : > { %p771_p9 = scmp.ne.s32.totalorder %s1008_s9, %s770_s20  ;;  %p779_p12 = scmp.lt.s32.totalorder %s770_s20, %s770_s20 }
  0x1f   : > { %p773_p10 = pnand %p771_p9, %p759_p13  ;;  %p780_p0 = por %p779_p12, %p778_p2 }
  0x21   : > { %p774_p1 = pneg %p773_p10 }
  0x23   : > { %p781_p6 = pnand %p780_p0, %p774_p1 }
  0x25   : > { %784 = shalt.err (!%p781_p6)
}
  0x26   : > { %s917_s21 = smov 128   ;;  %s918_s22 = smov 8  }
  0x27   : > { %700 = dma.hbm_to_vmem [thread:$0]  (!%p1015_p11), %s1207_s1, 512, %s1008_s9, [#allocation6], %s917_s21, %s917_s21, %s918_s22  }
  0x28   : > { %s785_s13 = scalar_lea.hbm %s1209_s3, 1024 }
  0x29   : > { %p786_p2 = scmp.ne.s32.totalorder %s1209_s3, %s785_s13  ;;  %p792_p10 = scmp.lt.u32.totalorder %s785_s13, %s1209_s3 }
  0x2b   : > { %p788_p1 = pnand %p786_p2, %p759_p13 }
  0x2d   : > { %p789_p6 = pneg %p788_p1 }
  0x2f   : > { %p794_p3 = pnand %p792_p10, %p789_p6 }
  0x31   : > { %797 = shalt.err (!%p794_p3)
}
  0x32   : > { %s798_s9 = scalar_lea.vmem %s1019_s12, 1024  ;;  %p806_p12 = scmp.lt.s32.totalorder %s1019_s12, %s1019_s12 }
  0x33   : > { %p799_p5 = scmp.ne.s32.totalorder %s1019_s12, %s798_s9  ;;  %p807_p0 = scmp.lt.s32.totalorder %s798_s9, %s798_s9 }
  0x35   : > { %p801_p7 = pnand %p799_p5, %p759_p13  ;;  %p808_p2 = por %p807_p0, %p806_p12 }
  0x37   : > { %p802_p9 = pneg %p801_p7 }
  0x39   : > { %p809_p1 = pnand %p808_p2, %p802_p9 }
  0x3b   : > { %812 = shalt.err (!%p809_p1)
}
  0x3c   : > { %703 = dma.hbm_to_vmem [thread:$0]  (!%p1015_p11), %s1209_s3, 1024, %s1019_s12, [#allocation6], %s917_s21, %s917_s21, %s918_s22  }
  0x3d   : > { %s1074_s20 = sadd.s32 1, %s913_s27   ;;  %s31_s10 = sadd.s32 1, %s909_s26 }
  0x3e   : > { %s28_s23 = ssub.s32 %s913_s27, %s1074_s20  ;;  %p38_p13 = scmp.ne.s32.totalorder %s909_s26, %s905_s25 }
  0x3f   : > { %p29_p6 = scmp.eq.s32.totalorder %s28_s23, 0  ;;  %p39_p10 = scmp.eq.s32.totalorder %s913_s27, 0 }
  0x40   : > { %p1221_p3 = scmp.eq.s32.totalorder %s985_s5, 1  ;;  %p714_p7 = scmp.lt.s32.totalorder %s913_s27, 2 }
  0x41   : > { %s1090_s8 = scalar_select %p29_p6, %s909_s26, %s31_s10  }
  0x42   : > { %p1084_p5 = por %p1221_p3, %p38_p13  ;;  %p40_p9 = por %p39_p10, %p38_p13 }
  0x43   : > { %s258_s11 = sand.u32 1, %s909_s26   ;;  %s609_s12 = sshll.u32 %s913_s27, 7 }
  0x44   : > { %s1222_s6 = scalar_select %p1084_p5, 1, 0 }
  0x45   : > { %s608_s13 = sshll.u32 %s258_s11, 3  ;;  %s1097_s14 = scalar_lea.hbm %s1206_s0, %s609_s12 }
  0x46   : > { %s262_s15 = scalar_lea.vmem [#allocation2], %s608_s13  ;;  %p1101_p11 = pnand %p714_p7, %p40_p9 }
  0x47   : > { %s269_s16 = sshll.u32 %s262_s15, 4  ;;  %s259_s9 = scalar_lea.sflag [#allocation3], %s258_s11  ;;  %s1099_s16 = int_to_ptr.vmem [resolvable:$true] %s269_s16 }
  0x48   : > { %s813_s18 = scalar_lea.hbm %s1097_s14, 128  ;;  %p815_p0 = pneg %p1101_p11 }
  0x49   : > { %p814_p12 = scmp.ne.s32.totalorder %s1097_s14, %s813_s18  ;;  %s818_s23 = scalar_lea.hbm %s1206_s0, 256 }
  0x4a   : > { %p819_p13 = scmp.lt.u32.totalorder %s1097_s14, %s1206_s0  ;;  %p820_p6 = scmp.lt.u32.totalorder %s818_s23, %s813_s18 }
  0x4b   : > { %p816_p2 = pnand %p815_p0, %p814_p12  ;;  %p822_p3 = scmp.lt.u32.totalorder %s813_s18, %s1097_s14 }
  0x4c   : > { %p821_p10 = por %p820_p6, %p819_p13 }
  0x4d   : > { %p817_p1 = pneg %p816_p2 }
  0x4e   : > { %p823_p7 = por %p822_p3, %p821_p10 }
  0x50   : > { %p824_p9 = pnand %p823_p7, %p817_p1 }
  0x52   : > { %827 = shalt.err (!%p824_p9)
}
  0x53   : > { %s828_s11 = scalar_lea.vmem %s1099_s16, 128  ;;  %s919_s21 = smov [#allocation2]  }
  0x54   : > { %p829_p12 = scmp.ne.s32.totalorder %s1099_s16, %s828_s11  ;;  %s833_s22 = sshll.u32 %s919_s21, 4  ;;  %s834_s22 = int_to_ptr.vmem [resolvable:$false] %s833_s22 }
  0x55   : > { %s835_s15 = scalar_lea.vmem %s834_s22, 256  ;;  %p836_p4 = scmp.lt.s32.totalorder %s1099_s16, %s834_s22 }
  0x56   : > { %p831_p2 = pnand %p829_p12, %p815_p0  ;;  %p837_p13 = scmp.lt.s32.totalorder %s835_s15, %s828_s11 }
  0x58   : > { %p832_p5 = pneg %p831_p2  ;;  %p838_p6 = por %p837_p13, %p836_p4 }
  0x5a   : > { %p839_p10 = pnand %p838_p6, %p832_p5 }
  0x5c   : > { %842 = shalt.err (!%p839_p10)
}
  0x5d   : > { %707 = dma.hbm_to_vmem [thread:$0]  (!%p1101_p11), %s1097_s14, 128, %s1099_s16, %s259_s9  }
  0x5e   : > { %278 = sbr.rel (%p1004_p8) target bundleno = 559 (0x22f), region = 48  ;;  %s1133_s18 = sand.u32 (!%p1004_p8), 1, %s905_s25  }
  0x5f   : > { %s611_s19 = sshll.u32 (!%p1004_p8), %s1133_s18, 3  ;;  %s281_s10 = scalar_lea.sflag (!%p1004_p8), [#allocation3], %s1133_s18 }
  0x60   : > { %s1139_s23 = scalar_lea.vmem (!%p1004_p8), [#allocation2], %s611_s19  ;;  %p1224_p4 = scmp.ne.s32.totalorder (!%p1004_p8), %s1217_s28, 0 }
  0x65   : > { %888 = dma.done.wait (%p1224_p4), %s281_s10, 128  }
  0x66   : > { %890 = vsyncadd (%p1224_p4), %s281_s10, 4294967168  ;;  %p1225_p5 = scmp.eq.s32.totalorder %s985_s5, 0 }
  0x68   : > { %892 = dma.done.wait (%p1225_p5), [#allocation6], 1536   ;;  %p1226_p8 = pmov %p1225_p5 }
  0x69   : > { %v920_v0 = vmov 0.0|0.0   ;;  %vm921_vm0 = vmmov 0   ;;  %v922_v1 = vmov 0.0   ;;  %v324_v2 = vld [vmem:[#allocation5] sm:$0xff]  ;;  %v325_v3 = vld [vmem:[#allocation5 + $0x8] sm:$0xff]  ;;  %v326_v4 = vld [vmem:[#allocation5 + $0x10] sm:$0xff] }
  0x6a   : > { %894 = vsyncadd (%p1226_p8), [#allocation6], 4294965760  ;;  %667 = vmatprep.subr.bf16.mxu0 %v920_v0  ;;  %645 = vmatprep.mubr.msk.f32.mxu0 %vm921_vm0, %v922_v1  ;;  %v668_v5 = vpack.c.bf16 %v325_v3, %v324_v2  ;;  %v327_v6 = vld [vmem:[#allocation5 + $0x18] sm:$0xff]  ;;  %v410_v7 = vld [vmem:[#allocation7] sm:$0xff]  ;;  %vm335_vm1 = vcmask 261120   ;;  %vm425_vm2 = vcmask 523264  }
  0x6b   : > { %673 = vmatprep.subr.bf16.mxu1 %v920_v0  ;;  %664 = vmatprep.mubr.msk.f32.mxu1 %vm921_vm0, %v922_v1  ;;  %v411_v8 = vld [vmem:[#allocation7 + $0x8] sm:$0xff]  ;;  %v412_v9 = vld [vmem:[#allocation7 + $0x10] sm:$0xff]  ;;  %v413_v10 = vld [vmem:[#allocation7 + $0x18] sm:$0xff]  ;;  %v671_v11 = vpack.c.bf16 %v327_v6, %v326_v4  ;;  %s620_s17 = sshll.u32 %s985_s5, 7  ;;  %s322_s9 = scalar_lea.vmem [#allocation8], %s611_s19 }
  0x6c   : > { %669 = vmatpush3.bf16.msra.mxu0 %v668_v5  ;;  %v674_v12 = vpack.c.bf16 %v411_v8, %v410_v7  ;;  %v677_v13 = vpack.c.bf16 %v413_v10, %v412_v9  ;;  %v414_v14 = vld [vmem:[#allocation7 + $0x20] sm:$0xff]  ;;  %v415_v15 = vld [vmem:[#allocation7 + $0x28] sm:$0xff]  ;;  %v323_v16 = vld [vmem:[%s1139_s23] sm:$0xff]  ;;  %s514_s13 = sshll.u32 %s322_s9, 4  ;;  %s1162_s21 = scalar_lea.hbm %s1213_s7, %s620_s17  ;;  %s1164_s13 = int_to_ptr.vmem [resolvable:$true] %s514_s13 }
  0x6d   : > { %670 = vmatprep.subr.bf16.mxu0 %v920_v0  ;;  %v680_v17 = vpack.c.bf16 %v415_v15, %v414_v14  ;;  %v416_v18 = vld [vmem:[#allocation7 + $0x30] sm:$0xff]  ;;  %v417_v19 = vld [vmem:[#allocation7 + $0x38] sm:$0xff]  ;;  %s501_s22 = scalar_lea.sflag [#allocation4], %s1133_s18  ;;  %s843_s15 = scalar_lea.vmem %s1164_s13, 128 }
  0x6e   : > { %675 = vmatpush3.bf16.msra.mxu1 %v674_v12  ;;  %v683_v20 = vpack.c.bf16 %v417_v19, %v416_v18  ;;  %v615_v21 = vld [vmem:[%s1208_s2] ss:$0 sm:$0xff]  ;;  %p844_p11 = scmp.ne.s32.totalorder %s1164_s13, %s843_s15  ;;  %p1227_p0 = scmp.ne.s32.totalorder %s1222_s6, 0 }
  0x6f   : > { %676 = vmatprep.subr.bf16.mxu1 %v920_v0  ;;  %v617_v26 = vld [vmem:[%s1210_s4] ss:$0 sm:$0xff]  ;;  %s923_s5 = smov [#allocation8]  }
  0x70   : > { %672 = vmatpush3.bf16.msra.mxu0 %v671_v11  ;;  %p845_p1 = pnand %p844_p11, %p1227_p0  ;;  %s847_s19 = sshll.u32 %s923_s5, 4  ;;  %s848_s19 = int_to_ptr.vmem [resolvable:$false] %s847_s19 }
  0x71   : > { %s849_s10 = scalar_lea.vmem %s848_s19, 256  ;;  %p850_p7 = scmp.lt.s32.totalorder %s1164_s13, %s848_s19 }
  0x72   : > { %678 = vmatpush3.bf16.msra.mxu1 %v677_v13  ;;  %p846_p3 = pneg %p845_p1  ;;  %p851_p9 = scmp.lt.s32.totalorder %s849_s10, %s843_s15 }
  0x73   : > { %646 = vmatmul.mubr.msk.f32.vlgmr.msra.gmra.mrb[0].mxu0 %vm335_vm1, %v323_v16  ;;  %679 = vmatprep.subr.bf16.mxu1 %v920_v0 }
  0x74   : > { %p852_p12 = por %p851_p9, %p850_p7 }
  0x76   : > { %681 = vmatpush3.bf16.msra.mxu1 %v680_v17  ;;  %p853_p2 = pnand %p852_p12, %p846_p3 }
  0x77   : > { %682 = vmatprep.subr.bf16.mxu1 %v920_v0 }
  0x7a   : > { %684 = vmatpush3.bf16.msra.mxu1 %v683_v20 }
 0x146   : > { %v405_v22 = vpop.f32.mrb[0].mxu0 }
 0x147   : > { %v406_v23 = vadd.f32 %v615_v21, %v405_v22  ;;  %v647_v24 = vpop.f32.mrb[1].mxu0 }
 0x149   : > { %v409_v25 = vmax.f32 %v406_v23, 0.0 }
 0x14b   : > { %665 = vmatmul.mubr.msk.f32.vlgmr.msra.gmra.mrb[0].mxu1 %vm425_vm2, %v409_v25 }
 0x21e   : > { %v495_v27 = vpop.f32.mrb[0].mxu1 }
 0x21f   : > { %v496_v28 = vadd.f32 %v617_v26, %v495_v27  ;;  %v666_v29 = vpop.f32.mrb[1].mxu1 }
 0x221   : > { %499 = vst [vmem:[%s322_s9] sm:$0xff] %v496_v28 }
 0x222   : > { %856 = shalt.err (!%p853_p2)
}
 0x223   : > { %s857_s18 = scalar_lea.hbm %s1162_s21, 128  ;;  %s861_s30 = scalar_lea.hbm %s1213_s7, 256 }
 0x224   : > { %p858_p13 = scmp.ne.s32.totalorder %s1162_s21, %s857_s18  ;;  %p862_p4 = scmp.lt.u32.totalorder %s1162_s21, %s1213_s7 }
 0x225   : > { %p863_p5 = scmp.lt.u32.totalorder %s861_s30, %s857_s18  ;;  %p865_p11 = scmp.lt.u32.totalorder %s857_s18, %s1162_s21 }
 0x226   : > { %p859_p6 = pnand %p858_p13, %p1227_p0 }
 0x227   : > { %p864_p8 = por %p863_p5, %p862_p4 }
 0x228   : > { %p860_p10 = pneg %p859_p6 }
 0x229   : > { %p866_p1 = por %p865_p11, %p864_p8 }
 0x22b   : > { %p867_p3 = pnand %p866_p1, %p860_p10 }
 0x22d   : > { %870 = shalt.err (!%p867_p3)
}
 0x22e   : > { %695 = dma.vmem_to_hbm [thread:$0]  (%p1227_p0), %s1164_s13, 128, %s1162_s21, %s501_s22  }
 0x22f PF: > { %s526_s17 = sand.u32 1, %s901_s24   ;;  %p1228_p7 = scmp.ne.s32.totalorder %s1218_s29, 0 }
 0x230   : > { %p1229_p9 = scmp.ge.s32.totalorder %s913_s27, 2  ;;  %s527_s9 = scalar_lea.sflag [#allocation4], %s526_s17 }
 0x232   : > { %p709_p12 = pnand %p1229_p9, %p1228_p7 }
 0x234   : > { %896 = dma.done.wait (!%p709_p12), %s527_s9, 128  }
 0x235   : > { %898 = vsyncadd (!%p709_p12), %s527_s9, 4294967168  ;;  %p21_p2 = scmp.ge.s32.totalorder %s1074_s20, 4   ;;  %s1230_s24 = smov %s905_s25 }
 0x236   : > { %s1231_s25 = smov %s909_s26  ;;  %s1232_s26 = smov %s1090_s8 }
 0x237   : > { %s1233_s27 = smov %s1074_s20  ;;  %23 = sbr.rel (!%p21_p2) target bundleno = 6 (0x6), region = 101 }
 0x23e   :  { %532 = vsyncpa [#allocation3], 1 }
 0x23f   :  { %534 = vsyncpa [#allocation3 + $0x1], 1 }
 0x240   :  { %535 = vsyncpa [#allocation6], 1 }
 0x241   :  { %536 = vsyncpa [#allocation4], 1 }
 0x242   :  { %538 = vsyncpa [#allocation4 + $0x1], 1 }

// kernel: tpu_custom_call.1
= control target key start
LH: loop header
LB: loop body
LE: loop exit
PB: predicated region body
PF: predicated region fallthrough
CT: control target
= control target key end

     0   :  { %12 = vsyncpa [#allocation3], 0  ;;  %s1206_s0 = inlined_call_operand.hbm [shape: f32[16,32], index: 0, kind: input, shape index: {}]   ;;  %s1207_s1 = inlined_call_operand.hbm [shape: f32[32,64], index: 1, kind: input, shape index: {}]   ;;  %s1208_s2 = inlined_call_operand.vmem [shape: f32[1,64], index: 2, kind: input, shape index: {}]   ;;  %s1209_s3 = inlined_call_operand.hbm [shape: f32[64,128], index: 3, kind: input, shape index: {}]   ;;  %s1210_s4 = inlined_call_operand.vmem [shape: f32[1,128], index: 4, kind: input, shape index: {}]   ;;  %s1211_s5 = inlined_call_operand.vmem [shape: f32[1,64], index: 5, kind: input, shape index: {}]   ;;  %s1212_s6 = inlined_call_operand.vmem [shape: f32[1,64], index: 6, kind: input, shape index: {}]   ;;  %s1213_s7 = inlined_call_operand.hbm [shape: f32[16,128], index: 7, kind: output, shape index: {}]  }
   0x1   :  { %14 = vsyncpa [#allocation3 + $0x1], 0 }
   0x2   :  { %15 = vsyncpa [#allocation6], 0 }
   0x3   :  { %16 = vsyncpa [#allocation4], 0 }
   0x4   :  { %18 = vsyncpa [#allocation4 + $0x1], 0  ;;  %s964_s24 = smov 0   ;;  %s966_s25 = smov 0  }
   0x5   :  { %s968_s26 = smov 0   ;;  %s970_s27 = smov 0  }
   0x6 LB: > { %s985_s5 = sadd.s32 4294967295, %s913_s27   ;;  %s603_s6 = sadd.s32 4294967294, %s913_s27   ;;  %s913_s27 = sphi %s970_s27, %s1233_s27   ;;  %s909_s26 = sphi %s968_s26, %s1232_s26   ;;  %s905_s25 = sphi %s966_s25, %s1231_s25   ;;  %s901_s24 = sphi %s964_s24, %s1230_s24  }
   0x7   : > { %p44_p0 = scmp.ne.s32.totalorder %s905_s25, %s901_s24  ;;  %p1214_p1 = scmp.eq.s32.totalorder %s985_s5, 0 }
   0x8   : > { %p200_p3 = scmp.eq.s32.totalorder %s603_s6, 1  ;;  %p604_p5 = scmp.ge.s32.totalorder %s913_s27, 1 }
   0x9   : > { %p994_p4 = por %p1214_p1, %p44_p0  ;;  %p207_p7 = scmp.lt.s32.totalorder %s913_s27, 3 }
   0xa   : > { %p999_p6 = por %p200_p3, %p44_p0  ;;  %s915_s8 = smov [#allocation5]  }
   0xb   : > { %s1217_s28 = scalar_select %p994_p4, 1, 0 }
   0xc   : > { %s1218_s29 = scalar_select %p999_p6, 1, 0 }
   0xd   : > { %p1004_p8 = pnand %p604_p5, %p207_p7  ;;  %s219_s9 = sshll.u32 %s915_s8, 4  ;;  %s1008_s9 = int_to_ptr.vmem [resolvable:$true] %s219_s9 }
   0xe   : > { %s916_s11 = smov [#allocation7]   ;;  %s757_s15 = scalar_lea.hbm %s1207_s1, 512 }
   0xf   : > { %p697_p9 = pneg %p1004_p8  ;;  %s235_s12 = sshll.u32 %s916_s11, 4  ;;  %s1019_s12 = int_to_ptr.vmem [resolvable:$true] %s235_s12 }
  0x10   : > { %p758_p12 = scmp.ne.s32.totalorder %s1207_s1, %s757_s15  ;;  %p764_p5 = scmp.lt.u32.totalorder %s757_s15, %s1207_s1 }
  0x11   : > { %p1015_p11 = pnand %p697_p9, %p1214_p1 }
  0x13   : > { %p759_p13 = pneg %p1015_p11 }
  0x15   : > { %p760_p0 = pnand %p759_p13, %p758_p12 }
  0x17   : > { %p761_p3 = pneg %p760_p0 }
  0x19   : > { %p766_p7 = pnand %p764_p5, %p761_p3 }
  0x1b   : > { %769 = shalt.err (!%p766_p7)
}
  0x1c   : > { %s770_s20 = scalar_lea.vmem %s1008_s9, 512  ;;  %p778_p2 = scmp.lt.s32.totalorder %s1008_s9, %s1008_s9 }
  0x1d   : > { %p771_p9 = scmp.ne.s32.totalorder %s1008_s9, %s770_s20  ;;  %p779_p12 = scmp.lt.s32.totalorder %s770_s20, %s770_s20 }
  0x1f   : > { %p773_p10 = pnand %p771_p9, %p759_p13  ;;  %p780_p0 = por %p779_p12, %p778_p2 }
  0x21   : > { %p774_p1 = pneg %p773_p10 }
  0x23   : > { %p781_p6 = pnand %p780_p0, %p774_p1 }
  0x25   : > { %784 = shalt.err (!%p781_p6)
}
  0x26   : > { %s917_s21 = smov 128   ;;  %s918_s22 = smov 8  }
  0x27   : > { %700 = dma.hbm_to_vmem [thread:$0]  (!%p1015_p11), %s1207_s1, 512, %s1008_s9, [#allocation6], %s917_s21, %s917_s21, %s918_s22  }
  0x28   : > { %s785_s13 = scalar_lea.hbm %s1209_s3, 1024 }
  0x29   : > { %p786_p2 = scmp.ne.s32.totalorder %s1209_s3, %s785_s13  ;;  %p792_p10 = scmp.lt.u32.totalorder %s785_s13, %s1209_s3 }
  0x2b   : > { %p788_p1 = pnand %p786_p2, %p759_p13 }
  0x2d   : > { %p789_p6 = pneg %p788_p1 }
  0x2f   : > { %p794_p3 = pnand %p792_p10, %p789_p6 }
  0x31   : > { %797 = shalt.err (!%p794_p3)
}
  0x32   : > { %s798_s9 = scalar_lea.vmem %s1019_s12, 1024  ;;  %p806_p12 = scmp.lt.s32.totalorder %s1019_s12, %s1019_s12 }
  0x33   : > { %p799_p5 = scmp.ne.s32.totalorder %s1019_s12, %s798_s9  ;;  %p807_p0 = scmp.lt.s32.totalorder %s798_s9, %s798_s9 }
  0x35   : > { %p801_p7 = pnand %p799_p5, %p759_p13  ;;  %p808_p2 = por %p807_p0, %p806_p12 }
  0x37   : > { %p802_p9 = pneg %p801_p7 }
  0x39   : > { %p809_p1 = pnand %p808_p2, %p802_p9 }
  0x3b   : > { %812 = shalt.err (!%p809_p1)
}
  0x3c   : > { %703 = dma.hbm_to_vmem [thread:$0]  (!%p1015_p11), %s1209_s3, 1024, %s1019_s12, [#allocation6], %s917_s21, %s917_s21, %s918_s22  }
  0x3d   : > { %s1074_s20 = sadd.s32 1, %s913_s27   ;;  %s31_s10 = sadd.s32 1, %s909_s26 }
  0x3e   : > { %s28_s23 = ssub.s32 %s913_s27, %s1074_s20  ;;  %p38_p13 = scmp.ne.s32.totalorder %s909_s26, %s905_s25 }
  0x3f   : > { %p29_p6 = scmp.eq.s32.totalorder %s28_s23, 0  ;;  %p39_p10 = scmp.eq.s32.totalorder %s913_s27, 0 }
  0x40   : > { %p1221_p3 = scmp.eq.s32.totalorder %s985_s5, 1  ;;  %p714_p7 = scmp.lt.s32.totalorder %s913_s27, 2 }
  0x41   : > { %s1090_s8 = scalar_select %p29_p6, %s909_s26, %s31_s10  }
  0x42   : > { %p1084_p5 = por %p1221_p3, %p38_p13  ;;  %p40_p9 = por %p39_p10, %p38_p13 }
  0x43   : > { %s258_s11 = sand.u32 1, %s909_s26   ;;  %s609_s12 = sshll.u32 %s913_s27, 7 }
  0x44   : > { %s1222_s6 = scalar_select %p1084_p5, 1, 0 }
  0x45   : > { %s608_s13 = sshll.u32 %s258_s11, 3  ;;  %s1097_s14 = scalar_lea.hbm %s1206_s0, %s609_s12 }
  0x46   : > { %s262_s15 = scalar_lea.vmem [#allocation2], %s608_s13  ;;  %p1101_p11 = pnand %p714_p7, %p40_p9 }
  0x47   : > { %s269_s16 = sshll.u32 %s262_s15, 4  ;;  %s259_s9 = scalar_lea.sflag [#allocation3], %s258_s11  ;;  %s1099_s16 = int_to_ptr.vmem [resolvable:$true] %s269_s16 }
  0x48   : > { %s813_s18 = scalar_lea.hbm %s1097_s14, 128  ;;  %p815_p0 = pneg %p1101_p11 }
  0x49   : > { %p814_p12 = scmp.ne.s32.totalorder %s1097_s14, %s813_s18  ;;  %s818_s23 = scalar_lea.hbm %s1206_s0, 256 }
  0x4a   : > { %p819_p13 = scmp.lt.u32.totalorder %s1097_s14, %s1206_s0  ;;  %p820_p6 = scmp.lt.u32.totalorder %s818_s23, %s813_s18 }
  0x4b   : > { %p816_p2 = pnand %p815_p0, %p814_p12  ;;  %p822_p3 = scmp.lt.u32.totalorder %s813_s18, %s1097_s14 }
  0x4c   : > { %p821_p10 = por %p820_p6, %p819_p13 }
  0x4d   : > { %p817_p1 = pneg %p816_p2 }
  0x4e   : > { %p823_p7 = por %p822_p3, %p821_p10 }
  0x50   : > { %p824_p9 = pnand %p823_p7, %p817_p1 }
  0x52   : > { %827 = shalt.err (!%p824_p9)
}
  0x53   : > { %s828_s11 = scalar_lea.vmem %s1099_s16, 128  ;;  %s919_s21 = smov [#allocation2]  }
  0x54   : > { %p829_p12 = scmp.ne.s32.totalorder %s1099_s16, %s828_s11  ;;  %s833_s22 = sshll.u32 %s919_s21, 4  ;;  %s834_s22 = int_to_ptr.vmem [resolvable:$false] %s833_s22 }
  0x55   : > { %s835_s15 = scalar_lea.vmem %s834_s22, 256  ;;  %p836_p4 = scmp.lt.s32.totalorder %s1099_s16, %s834_s22 }
  0x56   : > { %p831_p2 = pnand %p829_p12, %p815_p0  ;;  %p837_p13 = scmp.lt.s32.totalorder %s835_s15, %s828_s11 }
  0x58   : > { %p832_p5 = pneg %p831_p2  ;;  %p838_p6 = por %p837_p13, %p836_p4 }
  0x5a   : > { %p839_p10 = pnand %p838_p6, %p832_p5 }
  0x5c   : > { %842 = shalt.err (!%p839_p10)
}
  0x5d   : > { %707 = dma.hbm_to_vmem [thread:$0]  (!%p1101_p11), %s1097_s14, 128, %s1099_s16, %s259_s9  }
  0x5e   : > { %278 = sbr.rel (%p1004_p8) target bundleno = 559 (0x22f), region = 48  ;;  %s1133_s18 = sand.u32 (!%p1004_p8), 1, %s905_s25  }
  0x5f   : > { %s611_s19 = sshll.u32 (!%p1004_p8), %s1133_s18, 3  ;;  %s281_s10 = scalar_lea.sflag (!%p1004_p8), [#allocation3], %s1133_s18 }
  0x60   : > { %s1139_s23 = scalar_lea.vmem (!%p1004_p8), [#allocation2], %s611_s19  ;;  %p1224_p4 = scmp.ne.s32.totalorder (!%p1004_p8), %s1217_s28, 0 }
  0x65   : > { %888 = dma.done.wait (%p1224_p4), %s281_s10, 128  }
  0x66   : > { %890 = vsyncadd (%p1224_p4), %s281_s10, 4294967168  ;;  %p1225_p5 = scmp.eq.s32.totalorder %s985_s5, 0 }
  0x68   : > { %892 = dma.done.wait (%p1225_p5), [#allocation6], 1536   ;;  %p1226_p8 = pmov %p1225_p5 }
  0x69   : > { %v920_v0 = vmov 0.0|0.0   ;;  %vm921_vm0 = vmmov 0   ;;  %v922_v1 = vmov 0.0   ;;  %v324_v2 = vld [vmem:[#allocation5] sm:$0xff]  ;;  %v325_v3 = vld [vmem:[#allocation5 + $0x8] sm:$0xff]  ;;  %v326_v4 = vld [vmem:[#allocation5 + $0x10] sm:$0xff] }
  0x6a   : > { %894 = vsyncadd (%p1226_p8), [#allocation6], 4294965760  ;;  %667 = vmatprep.subr.bf16.mxu0 %v920_v0  ;;  %645 = vmatprep.mubr.msk.f32.mxu0 %vm921_vm0, %v922_v1  ;;  %v668_v5 = vpack.c.bf16 %v325_v3, %v324_v2  ;;  %v327_v6 = vld [vmem:[#allocation5 + $0x18] sm:$0xff]  ;;  %v410_v7 = vld [vmem:[#allocation7] sm:$0xff]  ;;  %vm335_vm1 = vcmask 261120   ;;  %vm425_vm2 = vcmask 523264  }
  0x6b   : > { %673 = vmatprep.subr.bf16.mxu1 %v920_v0  ;;  %664 = vmatprep.mubr.msk.f32.mxu1 %vm921_vm0, %v922_v1  ;;  %v411_v8 = vld [vmem:[#allocation7 + $0x8] sm:$0xff]  ;;  %v412_v9 = vld [vmem:[#allocation7 + $0x10] sm:$0xff]  ;;  %v413_v10 = vld [vmem:[#allocation7 + $0x18] sm:$0xff]  ;;  %v671_v11 = vpack.c.bf16 %v327_v6, %v326_v4  ;;  %s620_s17 = sshll.u32 %s985_s5, 7  ;;  %s322_s9 = scalar_lea.vmem [#allocation8], %s611_s19 }
  0x6c   : > { %669 = vmatpush3.bf16.msra.mxu0 %v668_v5  ;;  %v674_v12 = vpack.c.bf16 %v411_v8, %v410_v7  ;;  %v677_v13 = vpack.c.bf16 %v413_v10, %v412_v9  ;;  %v414_v14 = vld [vmem:[#allocation7 + $0x20] sm:$0xff]  ;;  %v415_v15 = vld [vmem:[#allocation7 + $0x28] sm:$0xff]  ;;  %v323_v16 = vld [vmem:[%s1139_s23] sm:$0xff]  ;;  %s514_s13 = sshll.u32 %s322_s9, 4  ;;  %s1162_s21 = scalar_lea.hbm %s1213_s7, %s620_s17  ;;  %s1164_s13 = int_to_ptr.vmem [resolvable:$true] %s514_s13 }
  0x6d   : > { %670 = vmatprep.subr.bf16.mxu0 %v920_v0  ;;  %v680_v17 = vpack.c.bf16 %v415_v15, %v414_v14  ;;  %v416_v18 = vld [vmem:[#allocation7 + $0x30] sm:$0xff]  ;;  %v417_v19 = vld [vmem:[#allocation7 + $0x38] sm:$0xff]  ;;  %s501_s22 = scalar_lea.sflag [#allocation4], %s1133_s18  ;;  %s843_s15 = scalar_lea.vmem %s1164_s13, 128 }
  0x6e   : > { %675 = vmatpush3.bf16.msra.mxu1 %v674_v12  ;;  %v683_v20 = vpack.c.bf16 %v417_v19, %v416_v18  ;;  %v615_v21 = vld [vmem:[%s1208_s2] ss:$0 sm:$0xff]  ;;  %p844_p11 = scmp.ne.s32.totalorder %s1164_s13, %s843_s15  ;;  %p1227_p0 = scmp.ne.s32.totalorder %s1222_s6, 0 }
  0x6f   : > { %676 = vmatprep.subr.bf16.mxu1 %v920_v0  ;;  %v617_v26 = vld [vmem:[%s1210_s4] ss:$0 sm:$0xff]  ;;  %s923_s5 = smov [#allocation8]  }
  0x70   : > { %672 = vmatpush3.bf16.msra.mxu0 %v671_v11  ;;  %p845_p1 = pnand %p844_p11, %p1227_p0  ;;  %s847_s19 = sshll.u32 %s923_s5, 4  ;;  %s848_s19 = int_to_ptr.vmem [resolvable:$false] %s847_s19 }
  0x71   : > { %s849_s10 = scalar_lea.vmem %s848_s19, 256  ;;  %p850_p7 = scmp.lt.s32.totalorder %s1164_s13, %s848_s19 }
  0x72   : > { %678 = vmatpush3.bf16.msra.mxu1 %v677_v13  ;;  %p846_p3 = pneg %p845_p1  ;;  %p851_p9 = scmp.lt.s32.totalorder %s849_s10, %s843_s15 }
  0x73   : > { %646 = vmatmul.mubr.msk.f32.vlgmr.msra.gmra.mrb[0].mxu0 %vm335_vm1, %v323_v16  ;;  %679 = vmatprep.subr.bf16.mxu1 %v920_v0 }
  0x74   : > { %p852_p12 = por %p851_p9, %p850_p7 }
  0x76   : > { %681 = vmatpush3.bf16.msra.mxu1 %v680_v17  ;;  %p853_p2 = pnand %p852_p12, %p846_p3 }
  0x77   : > { %682 = vmatprep.subr.bf16.mxu1 %v920_v0 }
  0x7a   : > { %684 = vmatpush3.bf16.msra.mxu1 %v683_v20 }
 0x146   : > { %v405_v22 = vpop.f32.mrb[0].mxu0 }
 0x147   : > { %v406_v23 = vadd.f32 %v615_v21, %v405_v22  ;;  %v647_v24 = vpop.f32.mrb[1].mxu0 }
 0x149   : > { %v409_v25 = vmax.f32 %v406_v23, 0.0 }
 0x14b   : > { %665 = vmatmul.mubr.msk.f32.vlgmr.msra.gmra.mrb[0].mxu1 %vm425_vm2, %v409_v25 }
 0x21e   : > { %v495_v27 = vpop.f32.mrb[0].mxu1 }
 0x21f   : > { %v496_v28 = vadd.f32 %v617_v26, %v495_v27  ;;  %v666_v29 = vpop.f32.mrb[1].mxu1 }
 0x221   : > { %499 = vst [vmem:[%s322_s9] sm:$0xff] %v496_v28 }
 0x222   : > { %856 = shalt.err (!%p853_p2)
}
 0x223   : > { %s857_s18 = scalar_lea.hbm %s1162_s21, 128  ;;  %s861_s30 = scalar_lea.hbm %s1213_s7, 256 }
 0x224   : > { %p858_p13 = scmp.ne.s32.totalorder %s1162_s21, %s857_s18  ;;  %p862_p4 = scmp.lt.u32.totalorder %s1162_s21, %s1213_s7 }
 0x225   : > { %p863_p5 = scmp.lt.u32.totalorder %s861_s30, %s857_s18  ;;  %p865_p11 = scmp.lt.u32.totalorder %s857_s18, %s1162_s21 }
 0x226   : > { %p859_p6 = pnand %p858_p13, %p1227_p0 }
 0x227   : > { %p864_p8 = por %p863_p5, %p862_p4 }
 0x228   : > { %p860_p10 = pneg %p859_p6 }
 0x229   : > { %p866_p1 = por %p865_p11, %p864_p8 }
 0x22b   : > { %p867_p3 = pnand %p866_p1, %p860_p10 }
 0x22d   : > { %870 = shalt.err (!%p867_p3)
}
 0x22e   : > { %695 = dma.vmem_to_hbm [thread:$0]  (%p1227_p0), %s1164_s13, 128, %s1162_s21, %s501_s22  }
 0x22f PF: > { %s526_s17 = sand.u32 1, %s901_s24   ;;  %p1228_p7 = scmp.ne.s32.totalorder %s1218_s29, 0 }
 0x230   : > { %p1229_p9 = scmp.ge.s32.totalorder %s913_s27, 2  ;;  %s527_s9 = scalar_lea.sflag [#allocation4], %s526_s17 }
 0x232   : > { %p709_p12 = pnand %p1229_p9, %p1228_p7 }
 0x234   : > { %896 = dma.done.wait (!%p709_p12), %s527_s9, 128  }
 0x235   : > { %898 = vsyncadd (!%p709_p12), %s527_s9, 4294967168  ;;  %p21_p2 = scmp.ge.s32.totalorder %s1074_s20, 4   ;;  %s1230_s24 = smov %s905_s25 }
 0x236   : > { %s1231_s25 = smov %s909_s26  ;;  %s1232_s26 = smov %s1090_s8 }
 0x237   : > { %s1233_s27 = smov %s1074_s20  ;;  %23 = sbr.rel (!%p21_p2) target bundleno = 6 (0x6), region = 101 }
 0x23e   :  { %532 = vsyncpa [#allocation3], 1 }
 0x23f   :  { %534 = vsyncpa [#allocation3 + $0x1], 1 }
 0x240   :  { %535 = vsyncpa [#allocation6], 1 }
 0x241   :  { %536 = vsyncpa [#allocation4], 1 }
 0x242   :  { %538 = vsyncpa [#allocation4 + $0x1], 1 }

</bundles_post_ra>
